<compile_context>
chip_gen: v7x
topology: tpu7x:2x2x1
jax: 0.10.0
libtpu: 0.0.40
codegen_flags: <defaults>
</compile_context>

<pallas_src>
import jax
import jax.numpy as jnp
from jax.experimental import pallas as pl
from jax.experimental.pallas import tpu as pltpu

LANE = 128


def _round_up(n, m):
    return ((n + m - 1) // m) * m


def _vmem_limit_bytes():
    """Generation-aware scoped-VMEM budget (32 MiB fallback is safe everywhere)."""
    try:
        cap = int(pltpu.get_tpu_info().vmem_capacity_bytes)
        # Use at most half of physical VMEM, never more than 64 MiB:
        #   v7x (64 MiB physical) -> 32 MiB, v5e/v6e (128 MiB) -> 64 MiB.
        return int(min(max(cap // 2, 32 * 1024 * 1024), 64 * 1024 * 1024))
    except Exception:
        return 32 * 1024 * 1024


def mlp_kernel(xT_ref, w1T_ref, b1_ref, w2T_ref, b2_ref, outT_ref):
    # fc1: (H, S) @ (S, tb) -> (H, tb), MXU matmul with f32 accumulation.
    h = jnp.dot(w1T_ref[...], xT_ref[...], preferred_element_type=jnp.float32)
    # Bias broadcast over the lane (batch) axis + ReLU, in f32 on the VPU.
    h = jnp.maximum(h + b1_ref[...], 0.0)
    # fc2: (A, H) @ (H, tb) -> (A, tb). Cast h to the weight dtype so the
    # optional bf16 weight path runs the MXU at its native bf16 rate.
    out = jnp.dot(w2T_ref[...], h.astype(w2T_ref.dtype),
                  preferred_element_type=jnp.float32) + b2_ref[...]
    # Lane-dense store: batch on lanes, only A (=2) sublanes written per tile.
    outT_ref[...] = out.astype(outT_ref.dtype)


def mlp_forward(x, w1, b1, w2, b2, *, block_b=2048, matmul_dtype=None,
                interpret=False):
    """relu(x @ w1 + b1) @ w2 + b2.

    x : (B, S), w1 : (S, H) (= torch Linear.weight.T), b1 : (1, H),
    w2 : (H, A), b2 : (1, A).  Returns (B, A).
    """
    B, S = x.shape
    H = w1.shape[1]
    A = w2.shape[1]
    out_dtype = x.dtype

    # ---- batch tiling (batch lives on the lane axis -> 128-lane granularity).
    block_b = max(LANE, (block_b // LANE) * LANE)
    B_pad = _round_up(B, LANE)
    if B_pad <= block_b:
        tb, n_steps = B_pad, 1                     # single tile, single grid step
    else:
        n_steps = pl.cdiv(B_pad, block_b)
        if n_steps % 2:                            # even grid -> balanced 2-TC split on v7x
            n_steps += 1
        tb = _round_up(pl.cdiv(B_pad, n_steps), LANE)
        B_pad = tb * n_steps
    grid = (n_steps,)

    # ---- transposed operands: batch on lanes everywhere.
    xT = x.T                                       # (S, B)
    if B_pad != B:
        xT = jnp.pad(xT, ((0, 0), (0, B_pad - B)))
    w1T = w1.T                                     # (H, S)
    w2T = w2.T                                     # (A, H)
    b1T = b1.reshape(H, 1).astype(jnp.float32)     # (H, 1)
    b2T = b2.reshape(A, 1).astype(jnp.float32)     # (A, 1)
    if matmul_dtype is not None:                   # bf16 MXU path for realistic H
        xT = xT.astype(matmul_dtype)
        w1T = w1T.astype(matmul_dtype)
        w2T = w2T.astype(matmul_dtype)

    outT = pl.pallas_call(
        mlp_kernel,
        out_shape=jax.ShapeDtypeStruct((A, B_pad), out_dtype),
        grid=grid,
        in_specs=[
            pl.BlockSpec((S, tb), lambda i: (0, i)),   # x^T  : streamed per batch tile
            pl.BlockSpec((H, S), lambda i: (0, 0)),    # W1^T : VMEM-resident
            pl.BlockSpec((H, 1), lambda i: (0, 0)),    # b1   : VMEM-resident
            pl.BlockSpec((A, H), lambda i: (0, 0)),    # W2^T : VMEM-resident
            pl.BlockSpec((A, 1), lambda i: (0, 0)),    # b2   : VMEM-resident
        ],
        out_specs=pl.BlockSpec((A, tb), lambda i: (0, i)),
        compiler_params=pltpu.CompilerParams(
            # Batch tiles are independent -> shard across both v7x TensorCores.
            dimension_semantics=("parallel",),
            vmem_limit_bytes=_vmem_limit_bytes(),
        ),
        interpret=interpret,
    )(xT, w1T, b1T, w2T, b2T)

    # Strip lane padding and restore (B, A) orientation (tiny A x B copy).
    return outT[:, :B].T


if __name__ == "__main__":
    # Small, CartPole-like sizes consistent with MLP(input_size=4, output_size=2, hidden_size=16).
    batch, in_size, hidden, out_size = 2, 4, 16, 2

    key = jax.random.PRNGKey(0)
    kx, k1, k2, k3, k4, kb = jax.random.split(key, 6)

    x = jax.random.normal(kx, (batch, in_size), dtype=jnp.float32)
    w1 = jax.random.uniform(k1, (in_size, hidden), jnp.float32, -0.5, 0.5)
    b1 = jax.random.uniform(k2, (1, hidden), jnp.float32, -0.5, 0.5)
    w2 = jax.random.uniform(k3, (hidden, out_size), jnp.float32, -0.25, 0.25)
    b2 = jax.random.uniform(k4, (1, out_size), jnp.float32, -0.25, 0.25)

    def ref_fwd(xv):
        return jnp.maximum(xv @ w1 + b1, 0.0) @ w2 + b2

    # 1) Small batch (single 128-lane tile, grid of 1).
    y = jax.block_until_ready(mlp_forward(x, w1, b1, w2, b2))
    assert y.shape == (batch, out_size)
    assert jnp.allclose(y, ref_fwd(x), atol=1e-4, rtol=1e-4)

    # 2) Larger, non-multiple-of-128 batch: collapses to ONE 640-lane tile
    #    (previously this was 3x256 grid steps).
    big_b = 600
    xb = jax.random.normal(kb, (big_b, in_size), dtype=jnp.float32)
    yb = jax.block_until_ready(mlp_forward(xb, w1, b1, w2, b2))
    assert yb.shape == (big_b, out_size)
    assert jnp.allclose(yb, ref_fwd(xb), atol=1e-4, rtol=1e-4)

    # 3) Force the multi-step pipelined grid path (rounded to an even grid).
    yt = jax.block_until_ready(mlp_forward(xb, w1, b1, w2, b2, block_b=256))
    assert yt.shape == (big_b, out_size)
    assert jnp.allclose(yt, ref_fwd(xb), atol=1e-4, rtol=1e-4)

    # 4) Optional bf16-matmul path (intended for realistic hidden sizes).
    ybf = jax.block_until_ready(
        mlp_forward(xb, w1, b1, w2, b2, matmul_dtype=jnp.bfloat16))
    assert ybf.shape == (big_b, out_size)
    assert jnp.allclose(ybf, ref_fwd(xb), atol=5e-2, rtol=5e-2)

    print("KERNEL_OK")
</pallas_src>

<mosaic_0001>
module attributes {stable_mosaic.version = 11 : i64} {
  func.func @mlp_kernel(%arg0: i32, %arg1: memref<4x128xf32, #tpu.memory_space<vmem>>, %arg2: memref<16x4xf32, #tpu.memory_space<vmem>>, %arg3: memref<16x1xf32, #tpu.memory_space<vmem>>, %arg4: memref<2x16xf32, #tpu.memory_space<vmem>>, %arg5: memref<2x1xf32, #tpu.memory_space<vmem>>, %arg6: memref<2x128xf32, #tpu.memory_space<vmem>>) attributes {dimension_semantics = [#tpu.dimension_semantics<parallel>], iteration_bounds = array<i64: 1>, scalar_prefetch = 0 : i64, scratch_operands = 0 : i64, tpu.core_type = #tpu.core_type<tc>, window_params = [{transform_indices = @transform_0, window_bounds = array<i64: 4, 128>}, {pipeline_mode = #tpu.pipeline_mode<synchronous>, transform_indices = @transform_1, window_bounds = array<i64: 16, 4>}, {pipeline_mode = #tpu.pipeline_mode<synchronous>, transform_indices = @transform_2, window_bounds = array<i64: 16, 1>}, {pipeline_mode = #tpu.pipeline_mode<synchronous>, transform_indices = @transform_3, window_bounds = array<i64: 2, 16>}, {pipeline_mode = #tpu.pipeline_mode<synchronous>, transform_indices = @transform_4, window_bounds = array<i64: 2, 1>}, {transform_indices = @transform_5, window_bounds = array<i64: 2, 128>}]} {
    %c0 = arith.constant 0 : index
    %c0_0 = arith.constant 0 : index
    %0 = vector.load %arg2[%c0, %c0_0] : memref<16x4xf32, #tpu.memory_space<vmem>>, vector<16x4xf32>
    %c0_1 = arith.constant 0 : index
    %c0_2 = arith.constant 0 : index
    %1 = vector.load %arg1[%c0_1, %c0_2] : memref<4x128xf32, #tpu.memory_space<vmem>>, vector<4x128xf32>
    %cst = arith.constant dense<0.000000e+00> : vector<16x128xf32>
    %2 = tpu.matmul %0, %1, %cst {dimension_numbers = #tpu.dot_dimension_numbers<[1], [0], [0], [1], [0, 0, 1, 1], [], []>} : vector<16x4xf32>, vector<4x128xf32>, vector<16x128xf32> -> vector<16x128xf32>
    %c0_3 = arith.constant 0 : index
    %c0_4 = arith.constant 0 : index
    %3 = vector.load %arg3[%c0_3, %c0_4] : memref<16x1xf32, #tpu.memory_space<vmem>>, vector<16x1xf32>
    %4 = vector.broadcast %3 : vector<16x1xf32> to vector<16x128xf32>
    %5 = arith.addf %2, %4 : vector<16x128xf32>
    %cst_5 = arith.constant 0.000000e+00 : f32
    %6 = vector.broadcast %cst_5 : f32 to vector<16x128xf32>
    %7 = arith.maximumf %5, %6 : vector<16x128xf32>
    %c0_6 = arith.constant 0 : index
    %c0_7 = arith.constant 0 : index
    %8 = vector.load %arg4[%c0_6, %c0_7] : memref<2x16xf32, #tpu.memory_space<vmem>>, vector<2x16xf32>
    %cst_8 = arith.constant dense<0.000000e+00> : vector<2x128xf32>
    %9 = tpu.matmul %8, %7, %cst_8 {dimension_numbers = #tpu.dot_dimension_numbers<[1], [0], [0], [1], [0, 0, 1, 1], [], []>} : vector<2x16xf32>, vector<16x128xf32>, vector<2x128xf32> -> vector<2x128xf32>
    %c0_9 = arith.constant 0 : index
    %c0_10 = arith.constant 0 : index
    %10 = vector.load %arg5[%c0_9, %c0_10] : memref<2x1xf32, #tpu.memory_space<vmem>>, vector<2x1xf32>
    %11 = vector.broadcast %10 : vector<2x1xf32> to vector<2x128xf32>
    %12 = arith.addf %9, %11 : vector<2x128xf32>
    %c0_11 = arith.constant 0 : index
    %c0_12 = arith.constant 0 : index
    %13 = vector.load %arg6[%c0_11, %c0_12] : memref<2x128xf32, #tpu.memory_space<vmem>>, vector<2x128xf32>
    tpu.vector_store %arg6[%c0_11, %c0_12], %12 {strides = array<i32>} : memref<2x128xf32, #tpu.memory_space<vmem>>, vector<2x128xf32>,
    return
  }
  func.func @transform_0(%arg0: i32) -> (i32, i32) {
    %c0_i32 = arith.constant 0 : i32
    %c0_i32_0 = arith.constant 0 : i32
    return %c0_i32, %arg0 : i32, i32
  }
  func.func @transform_1(%arg0: i32) -> (i32, i32) {
    %c0_i32 = arith.constant 0 : i32
    %c0_i32_0 = arith.constant 0 : i32
    %c0_i32_1 = arith.constant 0 : i32
    return %c0_i32, %c0_i32_0 : i32, i32
  }
  func.func @transform_2(%arg0: i32) -> (i32, i32) {
    %c0_i32 = arith.constant 0 : i32
    %c0_i32_0 = arith.constant 0 : i32
    %c0_i32_1 = arith.constant 0 : i32
    return %c0_i32, %c0_i32_0 : i32, i32
  }
  func.func @transform_3(%arg0: i32) -> (i32, i32) {
    %c0_i32 = arith.constant 0 : i32
    %c0_i32_0 = arith.constant 0 : i32
    %c0_i32_1 = arith.constant 0 : i32
    return %c0_i32, %c0_i32_0 : i32, i32
  }
  func.func @transform_4(%arg0: i32) -> (i32, i32) {
    %c0_i32 = arith.constant 0 : i32
    %c0_i32_0 = arith.constant 0 : i32
    %c0_i32_1 = arith.constant 0 : i32
    return %c0_i32, %c0_i32_0 : i32, i32
  }
  func.func @transform_5(%arg0: i32) -> (i32, i32) {
    %c0_i32 = arith.constant 0 : i32
    %c0_i32_0 = arith.constant 0 : i32
    return %c0_i32, %arg0 : i32, i32
  }
}

</mosaic_0001>

<bundles_post_ra>
// kernel: tpu_custom_call.1
= control target key start
LH: loop header
LB: loop body
LE: loop exit
PB: predicated region body
PF: predicated region fallthrough
CT: control target
= control target key end

     0   :  { %vm43_vm0 = vcmask 1043456   ;;  %vm36_vm1 = vcmask 31744   ;;  %s344_s0 = inlined_call_operand.vmem [shape: f32[4,128], index: 0, kind: input, shape index: {}]   ;;  %s345_s1 = inlined_call_operand.vmem [shape: f32[16,4], index: 1, kind: input, shape index: {}]   ;;  %s346_s2 = inlined_call_operand.vmem [shape: f32[16,1], index: 2, kind: input, shape index: {}]   ;;  %s347_s3 = inlined_call_operand.vmem [shape: f32[2,16], index: 3, kind: input, shape index: {}]   ;;  %s348_s4 = inlined_call_operand.vmem [shape: f32[2,1], index: 4, kind: input, shape index: {}]   ;;  %s349_s5 = inlined_call_operand.hbm [shape: f32[2,128], index: 5, kind: output, shape index: {}]  }
   0x1   :  { %v23_v0 = vld [vmem:[%s344_s0] sm:$0xf]  ;;  %v22_v2 = vld [vmem:[%s345_s1 + $0x8] sm:$0xff] }
   0x2   :  { %v21_v1 = vld [vmem:[%s345_s1] sm:$0xff]  ;;  %230 = vmatprep.subr.msk.mxu0 %vm43_vm0, %v23_v0 }
   0x3   :  { %232 = vmatprep.mubr.msk.f32.mxu0 %vm36_vm1, %v21_v1  ;;  %v24_v3 = vld [vmem:[%s346_s2] sm:$0xff] }
   0x4   :  { %10 = vsyncpa [#allocation3], 0  ;;  %231 = vmatpush3.msk.msra.mxu0 %vm43_vm0, %v23_v0  ;;  %v276_v4 = vmov 0   ;;  %v25_v5 = vld [vmem:[%s346_s2 + $0x8] sm:$0xff]  ;;  %v277_v6 = vmov 0.0|0.0   ;;  %vm278_vm2 = vmmov 0  }
   0x5   :  { %250 = vset.pattern.permute.xlu0 %v276_v4  ;;  %233 = vmatmul.mubr.msk.f32.vlgmr.msra.gmra.mrb[0].mxu0 %vm36_vm1, %v22_v2  ;;  %v279_v7 = vmov 0.0   ;;  %v125_v8 = vld [vmem:[%s348_s4] sm:$0x3]  ;;  %vm131_vm3 = vcmask 130048   ;;  %s280_s29 = smov [#allocation2]  }
   0x6   :  { %28 = vperm.xlu0 %250, %v24_v3   ;;  %251 = vset.pattern.permute.xlu1 %v276_v4  ;;  %v124_v18 = vld [vmem:[%s347_s3] sm:$0x3]  ;;  %s212_s4 = sshll.u32 %s280_s29, 4  ;;  %s213_s4 = int_to_ptr.vmem [resolvable:$true] %s212_s4 }
   0x7   :  { %242 = vmatprep.subr.bf16.mxu1 %v277_v6  ;;  %239 = vmatprep.mubr.msk.f32.mxu1 %vm278_vm2, %v279_v7  ;;  %s252_s30 = scalar_lea.vmem %s213_s4, 32  ;;  %p257_p1 = scmp.lt.s32.totalorder %s213_s4, %s213_s4 }
   0x8   :  { %128 = vperm.xlu1 %251, %v125_v8   ;;  %p253_p0 = scmp.ne.s32.totalorder %s213_s4, %s252_s30  ;;  %p258_p2 = scmp.lt.s32.totalorder %s252_s30, %s252_s30 }
   0xa   :  { %33 = vperm.xlu0 %250, %v25_v5   ;;  %p259_p3 = por %p258_p2, %p257_p1 }
   0xc   :  { %p260_p4 = pnand %p259_p3, %p253_p0 }
  0x85   :  { %v29_v9 = vpop.permute.xlu0 %28 }
  0x87   :  { %v129_v19 = vpop.permute.xlu1 %128 }
  0x89   :  { %v34_v10 = vpop.permute.xlu0 %33 }
  0xd8   :  { %v234_v11 = vpop.f32.mrb[0].mxu0 }
  0xd9   :  { %v119_v12 = vadd.f32 %v234_v11, %v34_v10  ;;  %v113_v13 = vpop.f32.mrb[1].mxu0 }
  0xda   :  { %v114_v14 = vadd.f32 %v113_v13, %v29_v9 }
  0xdb   :  { %v123_v15 = vmax.f32 %v119_v12, 0.0 }
  0xdc   :  { %v122_v16 = vmax.f32 %v114_v14, 0.0 }
  0xde   :  { %v243_v17 = vpack.c.bf16 %v123_v15, %v122_v16 }
  0xe0   :  { %244 = vmatpush3.bf16.msra.mxu1 %v243_v17 }
  0xe3   :  { %240 = vmatmul.mubr.msk.f32.vlgmr.msra.gmra.mrb[0].mxu1 %vm131_vm3, %v124_v18 }
 0x1b6   :  { %v201_v20 = vpop.f32.mrb[0].mxu1 }
 0x1b7   :  { %v202_v21 = vadd.f32 %v201_v20, %v129_v19  ;;  %v241_v22 = vpop.f32.mrb[1].mxu1 }
 0x1b9   :  { %205 = vst [vmem:[#allocation2] sm:$0x3] %v202_v21 }
 0x1ba   :  { %263 = shalt.err (!%p260_p4)
}
 0x1bb   :  { %s264_s3 = scalar_lea.hbm %s349_s5, 32 }
 0x1bc   :  { %p265_p5 = scmp.ne.s32.totalorder %s349_s5, %s264_s3  ;;  %p268_p6 = scmp.lt.u32.totalorder %s264_s3, %s349_s5 }
 0x1be   :  { %p270_p7 = pnand %p268_p6, %p265_p5 }
 0x1c0   :  { %273 = shalt.err (!%p270_p7)
}
 0x1c1   :  { %215 = dma.vmem_to_hbm [thread:$0]  %s213_s4, 32, %s349_s5, [#allocation3]  }
 0x1c2   :  { %274 = dma.done.wait [#allocation3], 32  }
 0x1c3   :  { %275 = vsyncadd [#allocation3], 4294967264 }
 0x1c4   :  { %219 = vsyncpa [#allocation3], 1 }

</bundles_post_ra>
